<compile_context>
chip_gen: v7x
topology: tpu7x:2x2x1
jax: 0.10.0
libtpu: 0.0.40
codegen_flags: <defaults>
</compile_context>

<pallas_src>
import functools

import jax
import jax.numpy as jnp
from jax import lax
from jax.experimental import pallas as pl
from jax.experimental.pallas import tpu as pltpu


def _round_up(x, m):
    return ((x + m - 1) // m) * m


def _cs_conv_kernel(Wp, HpWp_pad, n_per, xf_ref, w_ref, gb_ref, out_ref, col_ref):
    """One batch-chunk (n_per images) per grid step.

    xf_ref : (n_per, Cin, L_pad)      flat zero-padded images, bf16
    w_ref  : (Cout, 9*Cin)            fused conv weight (tap-major columns), bf16
    gb_ref : (Cout, 2)                packed [gate | offset], f32
    out_ref: (n_per, Cout, HpWp_pad)  conv output on the padded grid (border and
                                      lane padding cropped by the wrapper), f32
    col_ref: (9*Cin, HpWp_pad)        VMEM scratch holding the 9 shifted slabs, bf16
    """
    Cin = xf_ref.shape[1]
    gate = gb_ref[:, 0:1]                              # (Cout, 1) f32
    offset = gb_ref[:, 1:2]                            # (Cout, 1) f32

    for n in range(n_per):                             # static unroll
        # Build the fused column block: a 3x3/stride-1 conv on the flattened
        # padded grid == one matmul against 9 statically lane-shifted copies.
        for kh in range(3):
            for kw in range(3):
                k = kh * 3 + kw
                s = kh * Wp + kw                       # static lane shift of tap k
                col_ref[k * Cin:(k + 1) * Cin, :] = xf_ref[n, :, s:s + HpWp_pad]

        acc = jnp.dot(w_ref[...], col_ref[...],        # (Cout, HpWp_pad), MXU, f32 acc
                      preferred_element_type=jnp.float32)

        # ConcatSquash epilogue, precomputed in the wrapper (f32):
        #   (conv(x) + b) * sigmoid(Wg t + bg) + Wb t == conv(x) * gate + offset
        out_ref[n] = (acc * gate + offset).astype(out_ref.dtype)   # actfn = NONE


def concat_squash_conv2d(t, x_nchw, conv_w, conv_b, wg, bg, wb, *,
                         matmul_dtype=jnp.bfloat16):
    """t: scalar, x_nchw: (N, Cin, H, W), conv_w: (Cout, Cin, 3, 3)."""
    N, Cin, H, W = x_nchw.shape
    Cout, Cin_w, Kh, Kw = conv_w.shape
    assert (Kh, Kw) == (3, 3) and Cin_w == Cin

    Hp, Wp = H + 2, W + 2
    HpWp = Hp * Wp
    HpWp_pad = _round_up(HpWp, 128)                    # lane-dense output width
    s_max = 2 * Wp + 2                                 # largest static tap shift
    L_pad = _round_up(max(s_max + HpWp_pad, 2 * (Wp + 1) + HpWp), 128)

    # Grid: at most 2 "parallel" steps (both v7x TensorCores; <=2 serial steps
    # on single-TC v5e/v6e).  Each step handles n_per images.
    n_blocks = max(1, min(N, 2))
    n_per = -(-N // n_blocks)
    N_pad = n_per * n_blocks

    # glue: zero-pad spatially (pad=1), flatten (Hp, Wp) onto the lane axis,
    # add a (Wp+1)-element leading flat pad (so every 3x3 tap is a static,
    # in-bounds lane slice), and pad the flat axis to L_pad (128-multiple).
    xp = jnp.pad(x_nchw, ((0, N_pad - N), (0, 0), (1, 1), (1, 1)))  # (N_pad,Cin,Hp,Wp)
    xf = xp.reshape(N_pad, Cin, HpWp)
    xf = jnp.pad(xf, ((0, 0), (0, 0), (Wp + 1, L_pad - (Wp + 1) - HpWp)))
    xf = xf.astype(matmul_dtype)

    # (Cout, Cin, 3, 3) -> (Cout, 9*Cin); column index k*Cin + ci with
    # k = kh*3 + kw, matching the scratch fill order in the kernel.
    w_fused = jnp.transpose(conv_w, (0, 2, 3, 1)).reshape(Cout, 9 * Cin)
    w_fused = w_fused.astype(matmul_dtype)

    # hyper-gate / hyper-bias epilogue hoisted out of the kernel (f32):
    t_f = jnp.asarray(t, jnp.float32)
    gate = jax.nn.sigmoid(wg.reshape(-1).astype(jnp.float32) * t_f
                          + bg.reshape(-1).astype(jnp.float32))          # (Cout,)
    offset = conv_b.reshape(-1).astype(jnp.float32) * gate \
        + wb.reshape(-1).astype(jnp.float32) * t_f                       # (Cout,)
    gb = jnp.stack([gate, offset], axis=1).astype(jnp.float32)           # (Cout, 2)

    kernel = functools.partial(_cs_conv_kernel, Wp, HpWp_pad, n_per)

    out_p = pl.pallas_call(
        kernel,
        out_shape=jax.ShapeDtypeStruct((N_pad, Cout, HpWp_pad), jnp.float32),
        grid_spec=pltpu.PrefetchScalarGridSpec(
            num_scalar_prefetch=0,
            grid=(n_blocks,),
            in_specs=[
                pl.BlockSpec((n_per, Cin, L_pad), lambda b: (b, 0, 0)),
                pl.BlockSpec((Cout, 9 * Cin), lambda b: (0, 0)),
                pl.BlockSpec((Cout, 2), lambda b: (0, 0)),
            ],
            out_specs=pl.BlockSpec((n_per, Cout, HpWp_pad), lambda b: (b, 0, 0)),
            scratch_shapes=[pltpu.VMEM((9 * Cin, HpWp_pad), matmul_dtype)],
        ),
        compiler_params=pltpu.CompilerParams(
            dimension_semantics=("parallel",)),
    )(xf, w_fused, gb)

    # crop lane padding + padded border; already NCHW, no transpose needed.
    out = out_p[:N, :, :HpWp].reshape(N, Cout, Hp, Wp)[:, :, 1:H + 1, 1:W + 1]
    return out


def _reference(t, x_nchw, conv_w, conv_b, wg, bg, wb):
    y = lax.conv_general_dilated(
        x_nchw, conv_w, window_strides=(1, 1), padding=((1, 1), (1, 1)),
        dimension_numbers=("NCHW", "OIHW", "NCHW"))
    y = y + conv_b.reshape(1, -1, 1, 1)
    t2 = jnp.asarray(t, jnp.float32).reshape(1, 1)
    gate = jax.nn.sigmoid(t2 @ wg.T + bg)          # (1, Cout)
    hbias = t2 @ wb.T                              # (1, Cout)
    return y * gate.reshape(1, -1, 1, 1) + hbias.reshape(1, -1, 1, 1)


if __name__ == "__main__":
    # small shapes consistent with the module
    N, Cin, Cout, H, W = 2, 4, 8, 16, 16

    key = jax.random.PRNGKey(0)
    k1, k2, k3, k4, k5, k6 = jax.random.split(key, 6)
    x = jax.random.normal(k1, (N, Cin, H, W), jnp.float32)
    t = jnp.float32(0.37)

    # deterministic synthetic parameters (shapes from __init__)
    conv_w = 0.1 * jax.random.normal(k2, (Cout, Cin, 3, 3), jnp.float32)
    conv_b = 0.1 * jax.random.normal(k3, (Cout,), jnp.float32)
    wg = 0.5 * jax.random.normal(k4, (Cout, 1), jnp.float32)   # _hyper_gate.weight
    bg = 0.5 * jax.random.normal(k5, (Cout,), jnp.float32)     # _hyper_gate.bias
    wb = 0.5 * jax.random.normal(k6, (Cout, 1), jnp.float32)   # _hyper_bias.weight

    out = concat_squash_conv2d(t, x, conv_w, conv_b, wg, bg, wb)
    out = jax.block_until_ready(out)

    ref = _reference(t, x, conv_w, conv_b, wg, bg, wb)
    assert out.shape == (N, Cout, H, W)
    # relaxed tolerance: conv operands are carried in bf16 (f32 accumulation)
    assert jnp.allclose(out, ref, atol=2e-2, rtol=2e-2), \
        float(jnp.max(jnp.abs(out - ref)))

    print("KERNEL_OK")
</pallas_src>

<mosaic_0001>
module attributes {stable_mosaic.version = 11 : i64} {
  func.func @_cs_conv_kernel(%arg0: i32, %arg1: memref<1x4x512xbf16, #tpu.memory_space<vmem>>, %arg2: memref<8x36xbf16, #tpu.memory_space<vmem>>, %arg3: memref<8x2xf32, #tpu.memory_space<vmem>>, %arg4: memref<1x8x384xf32, #tpu.memory_space<vmem>>, %arg5: memref<36x384xbf16, #tpu.memory_space<vmem>>) attributes {dimension_semantics = [#tpu.dimension_semantics<parallel>], iteration_bounds = array<i64: 2>, scalar_prefetch = 0 : i64, scratch_operands = 1 : i64, tpu.core_type = #tpu.core_type<tc>, window_params = [{transform_indices = @transform_0, window_bounds = array<i64: 1, 4, 512>}, {pipeline_mode = #tpu.pipeline_mode<synchronous>, transform_indices = @transform_1, window_bounds = array<i64: 8, 36>}, {pipeline_mode = #tpu.pipeline_mode<synchronous>, transform_indices = @transform_2, window_bounds = array<i64: 8, 2>}, {transform_indices = @transform_3, window_bounds = array<i64: 1, 8, 384>}]} {
    %c0 = arith.constant 0 : index
    %c0_0 = arith.constant 0 : index
    %0 = vector.load %arg3[%c0, %c0_0] : memref<8x2xf32, #tpu.memory_space<vmem>>, vector<8x1xf32>
    %c0_1 = arith.constant 0 : index
    %c1 = arith.constant 1 : index
    %1 = vector.load %arg3[%c0_1, %c1] : memref<8x2xf32, #tpu.memory_space<vmem>>, vector<8x1xf32>
    %c0_2 = arith.constant 0 : index
    %c0_3 = arith.constant 0 : index
    %c0_4 = arith.constant 0 : index
    %2 = vector.load %arg1[%c0_2, %c0_3, %c0_4] : memref<1x4x512xbf16, #tpu.memory_space<vmem>>, vector<1x4x384xbf16>
    %3 = vector.shape_cast %2 : vector<1x4x384xbf16> to vector<4x384xbf16>
    %c0_5 = arith.constant 0 : index
    %c0_6 = arith.constant 0 : index
    %4 = vector.load %arg5[%c0_5, %c0_6] : memref<36x384xbf16, #tpu.memory_space<vmem>>, vector<4x384xbf16>
    tpu.vector_store %arg5[%c0_5, %c0_6], %3 {strides = array<i32>} : memref<36x384xbf16, #tpu.memory_space<vmem>>, vector<4x384xbf16>,
    %c0_7 = arith.constant 0 : index
    %c0_8 = arith.constant 0 : index
    %c1_9 = arith.constant 1 : index
    %5 = vector.load %arg1[%c0_7, %c0_8, %c1_9] : memref<1x4x512xbf16, #tpu.memory_space<vmem>>, vector<1x4x384xbf16>
    %6 = vector.shape_cast %5 : vector<1x4x384xbf16> to vector<4x384xbf16>
    %c4 = arith.constant 4 : index
    %c0_10 = arith.constant 0 : index
    %7 = vector.load %arg5[%c4, %c0_10] : memref<36x384xbf16, #tpu.memory_space<vmem>>, vector<4x384xbf16>
    tpu.vector_store %arg5[%c4, %c0_10], %6 {strides = array<i32>} : memref<36x384xbf16, #tpu.memory_space<vmem>>, vector<4x384xbf16>,
    %c0_11 = arith.constant 0 : index
    %c0_12 = arith.constant 0 : index
    %c2 = arith.constant 2 : index
    %8 = vector.load %arg1[%c0_11, %c0_12, %c2] : memref<1x4x512xbf16, #tpu.memory_space<vmem>>, vector<1x4x384xbf16>
    %9 = vector.shape_cast %8 : vector<1x4x384xbf16> to vector<4x384xbf16>
    %c8 = arith.constant 8 : index
    %c0_13 = arith.constant 0 : index
    %10 = vector.load %arg5[%c8, %c0_13] : memref<36x384xbf16, #tpu.memory_space<vmem>>, vector<4x384xbf16>
    tpu.vector_store %arg5[%c8, %c0_13], %9 {strides = array<i32>} : memref<36x384xbf16, #tpu.memory_space<vmem>>, vector<4x384xbf16>,
    %c0_14 = arith.constant 0 : index
    %c0_15 = arith.constant 0 : index
    %c18 = arith.constant 18 : index
    %11 = vector.load %arg1[%c0_14, %c0_15, %c18] : memref<1x4x512xbf16, #tpu.memory_space<vmem>>, vector<1x4x384xbf16>
    %12 = vector.shape_cast %11 : vector<1x4x384xbf16> to vector<4x384xbf16>
    %c12 = arith.constant 12 : index
    %c0_16 = arith.constant 0 : index
    %13 = vector.load %arg5[%c12, %c0_16] : memref<36x384xbf16, #tpu.memory_space<vmem>>, vector<4x384xbf16>
    tpu.vector_store %arg5[%c12, %c0_16], %12 {strides = array<i32>} : memref<36x384xbf16, #tpu.memory_space<vmem>>, vector<4x384xbf16>,
    %c0_17 = arith.constant 0 : index
    %c0_18 = arith.constant 0 : index
    %c19 = arith.constant 19 : index
    %14 = vector.load %arg1[%c0_17, %c0_18, %c19] : memref<1x4x512xbf16, #tpu.memory_space<vmem>>, vector<1x4x384xbf16>
    %15 = vector.shape_cast %14 : vector<1x4x384xbf16> to vector<4x384xbf16>
    %c16 = arith.constant 16 : index
    %c0_19 = arith.constant 0 : index
    %16 = vector.load %arg5[%c16, %c0_19] : memref<36x384xbf16, #tpu.memory_space<vmem>>, vector<4x384xbf16>
    tpu.vector_store %arg5[%c16, %c0_19], %15 {strides = array<i32>} : memref<36x384xbf16, #tpu.memory_space<vmem>>, vector<4x384xbf16>,
    %c0_20 = arith.constant 0 : index
    %c0_21 = arith.constant 0 : index
    %c20 = arith.constant 20 : index
    %17 = vector.load %arg1[%c0_20, %c0_21, %c20] : memref<1x4x512xbf16, #tpu.memory_space<vmem>>, vector<1x4x384xbf16>
    %18 = vector.shape_cast %17 : vector<1x4x384xbf16> to vector<4x384xbf16>
    %c20_22 = arith.constant 20 : index
    %c0_23 = arith.constant 0 : index
    %19 = vector.load %arg5[%c20_22, %c0_23] : memref<36x384xbf16, #tpu.memory_space<vmem>>, vector<4x384xbf16>
    tpu.vector_store %arg5[%c20_22, %c0_23], %18 {strides = array<i32>} : memref<36x384xbf16, #tpu.memory_space<vmem>>, vector<4x384xbf16>,
    %c0_24 = arith.constant 0 : index
    %c0_25 = arith.constant 0 : index
    %c36 = arith.constant 36 : index
    %20 = vector.load %arg1[%c0_24, %c0_25, %c36] : memref<1x4x512xbf16, #tpu.memory_space<vmem>>, vector<1x4x384xbf16>
    %21 = vector.shape_cast %20 : vector<1x4x384xbf16> to vector<4x384xbf16>
    %c24 = arith.constant 24 : index
    %c0_26 = arith.constant 0 : index
    %22 = vector.load %arg5[%c24, %c0_26] : memref<36x384xbf16, #tpu.memory_space<vmem>>, vector<4x384xbf16>
    tpu.vector_store %arg5[%c24, %c0_26], %21 {strides = array<i32>} : memref<36x384xbf16, #tpu.memory_space<vmem>>, vector<4x384xbf16>,
    %c0_27 = arith.constant 0 : index
    %c0_28 = arith.constant 0 : index
    %c37 = arith.constant 37 : index
    %23 = vector.load %arg1[%c0_27, %c0_28, %c37] : memref<1x4x512xbf16, #tpu.memory_space<vmem>>, vector<1x4x384xbf16>
    %24 = vector.shape_cast %23 : vector<1x4x384xbf16> to vector<4x384xbf16>
    %c28 = arith.constant 28 : index
    %c0_29 = arith.constant 0 : index
    %25 = vector.load %arg5[%c28, %c0_29] : memref<36x384xbf16, #tpu.memory_space<vmem>>, vector<4x384xbf16>
    tpu.vector_store %arg5[%c28, %c0_29], %24 {strides = array<i32>} : memref<36x384xbf16, #tpu.memory_space<vmem>>, vector<4x384xbf16>,
    %c0_30 = arith.constant 0 : index
    %c0_31 = arith.constant 0 : index
    %c38 = arith.constant 38 : index
    %26 = vector.load %arg1[%c0_30, %c0_31, %c38] : memref<1x4x512xbf16, #tpu.memory_space<vmem>>, vector<1x4x384xbf16>
    %27 = vector.shape_cast %26 : vector<1x4x384xbf16> to vector<4x384xbf16>
    %c32 = arith.constant 32 : index
    %c0_32 = arith.constant 0 : index
    %28 = vector.load %arg5[%c32, %c0_32] : memref<36x384xbf16, #tpu.memory_space<vmem>>, vector<4x384xbf16>
    tpu.vector_store %arg5[%c32, %c0_32], %27 {strides = array<i32>} : memref<36x384xbf16, #tpu.memory_space<vmem>>, vector<4x384xbf16>,
    %c0_33 = arith.constant 0 : index
    %c0_34 = arith.constant 0 : index
    %29 = vector.load %arg2[%c0_33, %c0_34] : memref<8x36xbf16, #tpu.memory_space<vmem>>, vector<8x36xbf16>
    %c0_35 = arith.constant 0 : index
    %c0_36 = arith.constant 0 : index
    %30 = vector.load %arg5[%c0_35, %c0_36] : memref<36x384xbf16, #tpu.memory_space<vmem>>, vector<36x384xbf16>
    %cst = arith.constant dense<0.000000e+00> : vector<8x384xf32>
    %31 = tpu.matmul %29, %30, %cst {dimension_numbers = #tpu.dot_dimension_numbers<[1], [0], [0], [1], [0, 0, 1, 1], [], []>} : vector<8x36xbf16>, vector<36x384xbf16>, vector<8x384xf32> -> vector<8x384xf32>
    %32 = vector.broadcast %0 : vector<8x1xf32> to vector<8x384xf32>
    %33 = arith.mulf %31, %32 : vector<8x384xf32>
    %34 = vector.broadcast %1 : vector<8x1xf32> to vector<8x384xf32>
    %35 = arith.addf %33, %34 : vector<8x384xf32>
    %c0_37 = arith.constant 0 : index
    %c0_38 = arith.constant 0 : index
    %c0_39 = arith.constant 0 : index
    %36 = vector.load %arg4[%c0_37, %c0_38, %c0_39] : memref<1x8x384xf32, #tpu.memory_space<vmem>>, vector<1x8x384xf32>
    %37 = vector.shape_cast %36 : vector<1x8x384xf32> to vector<8x384xf32>
    %38 = vector.shape_cast %35 : vector<8x384xf32> to vector<1x8x384xf32>
    tpu.vector_store %arg4[%c0_37, %c0_38, %c0_39], %38 {strides = array<i32>} : memref<1x8x384xf32, #tpu.memory_space<vmem>>, vector<1x8x384xf32>,
    return
  }
  func.func @transform_0(%arg0: i32) -> (i32, i32, i32) {
    %c0_i32 = arith.constant 0 : i32
    %c0_i32_0 = arith.constant 0 : i32
    %c0_i32_1 = arith.constant 0 : i32
    return %arg0, %c0_i32, %c0_i32_0 : i32, i32, i32
  }
  func.func @transform_1(%arg0: i32) -> (i32, i32) {
    %c0_i32 = arith.constant 0 : i32
    %c0_i32_0 = arith.constant 0 : i32
    %c0_i32_1 = arith.constant 0 : i32
    return %c0_i32, %c0_i32_0 : i32, i32
  }
  func.func @transform_2(%arg0: i32) -> (i32, i32) {
    %c0_i32 = arith.constant 0 : i32
    %c0_i32_0 = arith.constant 0 : i32
    %c0_i32_1 = arith.constant 0 : i32
    return %c0_i32, %c0_i32_0 : i32, i32
  }
  func.func @transform_3(%arg0: i32) -> (i32, i32, i32) {
    %c0_i32 = arith.constant 0 : i32
    %c0_i32_0 = arith.constant 0 : i32
    %c0_i32_1 = arith.constant 0 : i32
    return %arg0, %c0_i32, %c0_i32_0 : i32, i32, i32
  }
}

</mosaic_0001>

<bundles_post_ra>
// kernel: tpu_custom_call.1
= control target key start
LH: loop header
LB: loop body
LE: loop exit
PB: predicated region body
PF: predicated region fallthrough
CT: control target
= control target key end

     0   :  { %8 = vsyncpa [#allocation4], 0  ;;  %s1143_s0 = inlined_call_operand.hbm [shape: bf16[2,4,512], index: 0, kind: input, shape index: {}]   ;;  %s1144_s1 = inlined_call_operand.vmem [shape: bf16[8,36], index: 1, kind: input, shape index: {}]   ;;  %s1145_s2 = inlined_call_operand.vmem [shape: f32[8,2], index: 2, kind: input, shape index: {}]   ;;  %s1146_s3 = inlined_call_operand.hbm [shape: f32[2,8,384], index: 3, kind: output, shape index: {}]  }
   0x1   :  { %10 = vsyncpa [#allocation4 + $0x1], 0 }
   0x2   :  { %11 = vsyncpa [#allocation5], 0 }
   0x3   :  { %13 = vsyncpa [#allocation5 + $0x1], 0  ;;  %s959_s12 = smov 0   ;;  %s961_s13 = smov 0  }
   0x4   :  { %s963_s14 = smov 0   ;;  %s965_s15 = smov 0  }
   0x5 LB: > { %s980_s16 = sadd.s32 4294967295, %s922_s15   ;;  %s708_s17 = sadd.s32 4294967294, %s922_s15   ;;  %s922_s15 = sphi %s965_s15, %s1161_s15   ;;  %s918_s14 = sphi %s963_s14, %s1160_s14   ;;  %s914_s13 = sphi %s961_s13, %s1159_s13   ;;  %s910_s12 = sphi %s959_s12, %s1158_s12  }
   0x6   : > { %s984_s18 = sadd.s32 1, %s922_s15   ;;  %s26_s19 = sadd.s32 1, %s918_s14 }
   0x7   : > { %s23_s20 = ssub.s32 %s922_s15, %s984_s18  ;;  %p33_p0 = scmp.ne.s32.totalorder %s918_s14, %s914_s13 }
   0x8   : > { %p24_p1 = scmp.eq.s32.totalorder %s23_s20, 0  ;;  %p34_p2 = scmp.eq.s32.totalorder %s922_s15, 0 }
   0x9   : > { %p39_p3 = scmp.ne.s32.totalorder %s914_s13, %s910_s12  ;;  %p40_p4 = scmp.eq.s32.totalorder %s980_s16, 0 }
   0xa   : > { %s996_s21 = scalar_select %p24_p1, %s918_s14, %s26_s19  }
   0xb   : > { %p998_p5 = por %p34_p2, %p33_p0  ;;  %p1002_p6 = por %p40_p4, %p39_p3 }
   0xc   : > { %p105_p7 = scmp.eq.s32.totalorder %s980_s16, 1  ;;  %p111_p8 = scmp.eq.s32.totalorder %s708_s17, 1 }
   0xd   : > { %p762_p10 = scmp.lt.s32.totalorder %s922_s15, 2  ;;  %s137_s26 = sand.u32 1, %s918_s14  }
   0xe   : > { %p1009_p11 = por %p105_p7, %p33_p0  ;;  %p1013_p12 = por %p111_p8, %p39_p3 }
   0xf   : > { %s733_s27 = sshll.u32 %s922_s15, 7  ;;  %s711_s28 = sshll.u32 %s137_s26, 3 }
  0x10   : > { %s1150_s24 = scalar_select %p1009_p11, 1, 0 }
  0x11   : > { %s1151_s25 = scalar_select %p1013_p12, 1, 0 }
  0x12   : > { %s1022_s4 = scalar_lea.hbm %s1143_s0, %s733_s27  ;;  %s141_s5 = scalar_lea.vmem [#allocation3], %s711_s28 }
  0x13   : > { %s149_s6 = sshll.u32 %s141_s5, 4  ;;  %p1026_p13 = pnand %p762_p10, %p998_p5  ;;  %s1030_s6 = int_to_ptr.vmem [resolvable:$true] %s149_s6 }
  0x14   : > { %s138_s8 = scalar_lea.sflag [#allocation4], %s137_s26  ;;  %s826_s9 = scalar_lea.hbm %s1022_s4, 128 }
  0x15   : > { %p827_p2 = scmp.ne.s32.totalorder %s1022_s4, %s826_s9  ;;  %p828_p3 = pneg %p1026_p13 }
  0x16   : > { %s831_s17 = scalar_lea.hbm %s1143_s0, 256  ;;  %p832_p5 = scmp.lt.u32.totalorder %s1022_s4, %s1143_s0 }
  0x17   : > { %p829_p4 = pnand %p828_p3, %p827_p2  ;;  %p833_p8 = scmp.lt.u32.totalorder %s831_s17, %s826_s9 }
  0x18   : > { %p835_p9 = scmp.lt.u32.totalorder %s826_s9, %s1022_s4 }
  0x19   : > { %p830_p7 = pneg %p829_p4  ;;  %p834_p10 = por %p833_p8, %p832_p5 }
  0x1b   : > { %p836_p0 = por %p835_p9, %p834_p10 }
  0x1d   : > { %p837_p1 = pnand %p836_p0, %p830_p7 }
  0x1f   : > { %840 = shalt.err (!%p837_p1)
}
  0x20   : > { %s841_s22 = scalar_lea.vmem %s1030_s6, 128  ;;  %s924_s26 = smov [#allocation3]  }
  0x21   : > { %p842_p2 = scmp.ne.s32.totalorder %s1030_s6, %s841_s22  ;;  %s846_s27 = sshll.u32 %s924_s26, 4  ;;  %s847_s27 = int_to_ptr.vmem [resolvable:$false] %s846_s27 }
  0x22   : > { %s848_s28 = scalar_lea.vmem %s847_s27, 256  ;;  %p849_p11 = scmp.lt.s32.totalorder %s1030_s6, %s847_s27 }
  0x23   : > { %p844_p4 = pnand %p842_p2, %p828_p3  ;;  %p850_p5 = scmp.lt.s32.totalorder %s848_s28, %s841_s22 }
  0x25   : > { %p845_p12 = pneg %p844_p4  ;;  %p851_p8 = por %p850_p5, %p849_p11 }
  0x27   : > { %p852_p9 = pnand %p851_p8, %p845_p12 }
  0x29   : > { %855 = shalt.err (!%p852_p9)
}
  0x2a   : > { %757 = dma.hbm_to_vmem [thread:$0]  (!%p1026_p13), %s1022_s4, 128, %s1030_s6, %s138_s8  }
  0x2b   : > { %p1153_p0 = scmp.lt.s32.totalorder %s922_s15, 3  ;;  %p1154_p1 = scmp.ge.s32.totalorder %s922_s15, 1 }
  0x2d   : > { %p155_p3 = pnand %p1154_p1, %p1153_p0 }
  0x2e   : > { %s1064_s29 = sand.u32 (!%p155_p3), 1, %s914_s13  }
  0x2f   : > { %158 = sbr.rel (%p155_p3) target bundleno = 456 (0x1c8), region = 32  ;;  %s715_s30 = sshll.u32 (!%p155_p3), %s1064_s29, 3 }
  0x30   : > { %s161_s5 = scalar_lea.sflag (!%p155_p3), [#allocation4], %s1064_s29  ;;  %s164_s9 = scalar_lea.vmem (!%p155_p3), [#allocation3], %s715_s30 }
  0x36   : > { %901 = dma.done.wait (%p1002_p6), %s161_s5, 128  }
  0x37   : > { %903 = vsyncadd (%p1002_p6), %s161_s5, 4294967168  ;;  %v216_v0 = vlaneseq  ;;  %v925_v1 = vmov 1983009808   ;;  %v242_v6 = vld [vmem:[%s164_s9] sm:$0xff]  ;;  %s926_s4 = smov 126   ;;  %s927_s6 = smov 127  }
  0x38   : > { %v214_v2 = vunpack.c.l.s4 %v925_v1  ;;  %v189_v7 = vld [vmem:[%s164_s9] sm:$0x3f]  ;;  %v244_v10 = vcombine.high %v242_v6, %v242_v6  ;;  %v212_v11 = vcombine.low %v242_v6, %v242_v6  ;;  %s928_s23 = smov 110   ;;  %s929_s7 = smov 109   ;;  %v930_v14 = vmov 0.0  }
  0x39   : > { %v217_v3 = vshrl.u32 %v216_v0, 7  ;;  %v191_v9 = vcombine.high %v189_v7, %v189_v7  ;;  %716 = vst.sshfl [vmem:[#allocation2] sm:$0xf pattern:$0x76325410] %v189_v7  ;;  %738 = vmatprep.subr.bf16.mxu1 %v930_v14  ;;  %s931_s8 = smov 108  }
  0x3a   : > { %v215_v4 = vunpack.c.0.s8 %v214_v2  ;;  %s932_s10 = smov 92   ;;  %s933_s11 = smov 91   ;;  %vm935_vm0 = vmmov 0   ;;  %v936_v15 = vmov 0   ;;  %v188_v16 = vld [vmem:[%s1145_s2] sm:$0xff]  ;;  %v937_v17 = vmov 1  }
  0x3b   : > { %717 = vst.sshfl [vmem:[#allocation2 + $0x8] sm:$0x3 pattern:$0x76325410] %v191_v9  ;;  %s934_s17 = smov 90   ;;  %744 = vmatprep.mubr.msk.bf16.mxu1 %vm935_vm0, %v930_v14  ;;  %556 = vmatprep.mubr.bf16.mxu0 %v936_v15  ;;  %vm235_vm1 = vcmask 1039360  }
  0x3c   : > { %v218_v5 = vsub.s32 %v215_v4, %v217_v3  ;;  %809 = vset.pattern.permute.xlu0 %v936_v15  ;;  %810 = vset.pattern.permute.xlu1 %v937_v17  ;;  %vm297_vm2 = vcmask 900096   ;;  %vm233_vm3 = vcmask 1043456   ;;  %vm266_vm4 = vcmask 1031168   ;;  %s748_s27 = smul.u32 24, %s1064_s29  ;;  %p1155_p11 = scmp.ne.s32.totalorder %s1150_s24, 0 }
  0x3d   : > { %vm328_vm5 = vcmask 891904   ;;  %vm359_vm6 = vcmask 883712   ;;  %vm390_vm7 = vcmask 752640   ;;  %vm421_vm8 = vcmask 744448   ;;  %s749_s28 = smul.u32 384, %s980_s16  ;;  %s624_s16 = scalar_lea.sflag [#allocation5], %s1064_s29 }
  0x3e   : > { %v251_v8 = vrot.slane %v242_v6, %v218_v5  ;;  %v258_v12 = vrot.slane %v244_v10, %v218_v5  ;;  %v219_v13 = vrot.slane %v212_v11, %v218_v5  ;;  %vm452_vm9 = vcmask 736256   ;;  %s186_s30 = scalar_lea.vmem [#allocation6], %s748_s27 }
  0x3f   : > { %vm514_vm10 = vcmask 1041408   ;;  %vm510_vm11 = vcmask 293888   ;;  %s638_s5 = sshll.u32 %s186_s30, 4  ;;  %s1101_s5 = int_to_ptr.vmem [resolvable:$true] %s638_s5 }
  0x40   : > { %259 = vrot.lane.b32.xlu1 %v251_v8, %s926_s4  ;;  %229 = vrot.lane.b32.xlu0 %v251_v8, %s927_s6 }
  0x44   : > { %292 = vrot.lane.b32.xlu1 %v251_v8, %s928_s23  ;;  %321 = vrot.lane.b32.xlu0 %v251_v8, %s929_s7 }
  0x48   : > { %261 = vrot.lane.b32.xlu1 %v258_v12, %s926_s4  ;;  %227 = vrot.lane.b32.xlu0 %v219_v13, %s927_s6  ;;  %s1099_s6 = scalar_lea.hbm %s1146_s3, %s749_s28 }
  0x4c   : > { %323 = vrot.lane.b32.xlu1 %v258_v12, %s929_s7  ;;  %290 = vrot.lane.b32.xlu0 %v219_v13, %s928_s23  ;;  %s856_s23 = scalar_lea.vmem %s1101_s5, 384  ;;  %s938_s7 = smov [#allocation6]  }
  0x4d   : > { %p857_p6 = scmp.ne.s32.totalorder %s1101_s5, %s856_s23 }
  0x4f   : > { %p858_p12 = pnand %p857_p6, %p1155_p11 }
  0x50   : > { %354 = vrot.lane.b32.xlu1 %v251_v8, %s931_s8  ;;  %352 = vrot.lane.b32.xlu0 %v219_v13, %s931_s8  ;;  %s860_s8 = sshll.u32 %s938_s7, 4  ;;  %s861_s8 = int_to_ptr.vmem [resolvable:$false] %s860_s8 }
  0x51   : > { %p859_p13 = pneg %p858_p12  ;;  %p863_p7 = scmp.lt.s32.totalorder %s1101_s5, %s861_s8 }
  0x54   : > { %385 = vrot.lane.b32.xlu1 %v258_v12, %s932_s10  ;;  %383 = vrot.lane.b32.xlu0 %v251_v8, %s932_s10  ;;  %s862_s10 = scalar_lea.vmem %s861_s8, 768 }
  0x55   : > { %p864_p10 = scmp.lt.s32.totalorder %s862_s10, %s856_s23 }
  0x57   : > { %p865_p2 = por %p864_p10, %p863_p7 }
  0x58   : > { %416 = vrot.lane.b32.xlu1 %v251_v8, %s933_s11  ;;  %414 = vrot.lane.b32.xlu0 %v219_v13, %s933_s11 }
  0x59   : > { %p866_p4 = pnand %p865_p2, %p859_p13 }
  0x5c   : > { %447 = vrot.lane.b32.xlu1 %v258_v12, %s934_s17  ;;  %445 = vrot.lane.b32.xlu0 %v251_v8, %s934_s17 }
  0x60   : > { %607 = vperm.xlu0 %809, %v188_v16   ;;  %614 = vperm.xlu1 %810, %v188_v16  }
  0x64   : > { %811 = vset.pattern.permute.xlu0 %v937_v17 }
  0xb2   : > { %v260_v18 = vpop.permute.xlu1 %259  ;;  %v230_v19 = vpop.permute.xlu0 %229 }
  0xb3   : > { %v232_v20 = vrot.slane %v230_v19, 4  ;;  %v263_v28 = vrot.slane %v260_v18, 4 }
  0xb5   : > { %v237_v21 = vsel %vm235_vm1, %v230_v19, %v232_v20 }
  0xb6   : > { %241 = vst [vmem:[#allocation2 + $0x8] sm:$0xc] %v237_v21  ;;  %v293_v22 = vpop.permute.xlu1 %292  ;;  %v322_v23 = vpop.permute.xlu0 %321 }
  0xb7   : > { %v295_v24 = vrot.slane %v293_v22, 4  ;;  %v325_v38 = vrot.slane %v322_v23, 4 }
  0xb9   : > { %v299_v25 = vsel %vm297_vm2, %v293_v22, %v295_v24  ;;  %v459_v22 = vld [vmem:[%s1144_s1] sm:$0xf] }
  0xba   : > { %303 = vst [vmem:[#allocation2 + $0x14] sm:$0xc] %v299_v25  ;;  %v262_v26 = vpop.permute.xlu1 %261  ;;  %v228_v27 = vpop.permute.xlu0 %227 }
  0xbb   : > { %v264_v29 = vrot.slane %v262_v26, 4  ;;  %v231_v30 = vrot.slane %v228_v27, 4 }
  0xbd   : > { %v265_v31 = vsel %vm233_vm3, %v263_v28, %v264_v29  ;;  %v268_v32 = vsel %vm266_vm4, %v262_v26, %v264_v29  ;;  %v234_v33 = vsel %vm233_vm3, %v231_v30, %v232_v20 }
  0xbe   : > { %v267_v34 = vsel %vm266_vm4, %v260_v18, %v265_v31  ;;  %272 = vst [vmem:[#allocation2 + $0x14] sm:$0x3] %v268_v32  ;;  %v236_v35 = vsel %vm235_vm1, %v228_v27, %v234_v33  ;;  %v324_v36 = vpop.permute.xlu1 %323  ;;  %v291_v37 = vpop.permute.xlu0 %290 }
  0xbf   : > { %271 = vst [vmem:[#allocation2 + $0xc] sm:$0x33] %v267_v34  ;;  %240 = vst [vmem:[#allocation2] sm:$0xcc] %v236_v35  ;;  %v326_v39 = vrot.slane %v324_v36, 4  ;;  %v294_v40 = vrot.slane %v291_v37, 4 }
  0xc1   : > { %v327_v41 = vsel %vm233_vm3, %v325_v38, %v326_v39  ;;  %v330_v42 = vsel %vm328_vm5, %v324_v36, %v326_v39  ;;  %v296_v43 = vsel %vm233_vm3, %v294_v40, %v295_v24 }
  0xc2   : > { %v329_v44 = vsel %vm328_vm5, %v322_v23, %v327_v41  ;;  %334 = vst [vmem:[#allocation2 + $0x20] sm:$0x3] %v330_v42  ;;  %v298_v45 = vsel %vm297_vm2, %v291_v37, %v296_v43  ;;  %v355_v46 = vpop.permute.xlu1 %354  ;;  %v353_v47 = vpop.permute.xlu0 %352 }
  0xc3   : > { %333 = vst [vmem:[#allocation2 + $0x18] sm:$0x33] %v329_v44  ;;  %302 = vst [vmem:[#allocation2 + $0xc] sm:$0xcc] %v298_v45  ;;  %v357_v48 = vrot.slane %v355_v46, 4  ;;  %v356_v49 = vrot.slane %v353_v47, 4 }
  0xc5   : > { %v361_v50 = vsel %vm359_vm6, %v355_v46, %v357_v48  ;;  %v358_v51 = vsel %vm233_vm3, %v356_v49, %v357_v48  ;;  %v815_v52 = vld [vmem:[#allocation2 + $0x8] ss:$12 sps:$4 sm:$0xff]  }
  0xc6   : > { %365 = vst [vmem:[#allocation2 + $0x20] sm:$0xc] %v361_v50  ;;  %v360_v53 = vsel %vm359_vm6, %v353_v47, %v358_v51  ;;  %v386_v54 = vpop.permute.xlu1 %385  ;;  %v384_v55 = vpop.permute.xlu0 %383  ;;  %739 = vmatpush3.bf16.msra.mxu1 %v815_v52 }
  0xc7   : > { %364 = vst [vmem:[#allocation2 + $0x18] sm:$0xcc] %v360_v53  ;;  %v388_v56 = vrot.slane %v386_v54, 4  ;;  %v387_v57 = vrot.slane %v384_v55, 4  ;;  %740 = vmatprep.subr.bf16.mxu1 %v930_v14 }
  0xc9   : > { %v392_v58 = vsel %vm390_vm7, %v386_v54, %v388_v56  ;;  %v389_v59 = vsel %vm233_vm3, %v387_v57, %v388_v56 }
  0xca   : > { %396 = vst [vmem:[#allocation2 + $0x2c] sm:$0x3] %v392_v58  ;;  %v391_v60 = vsel %vm390_vm7, %v384_v55, %v389_v59  ;;  %v417_v61 = vpop.permute.xlu1 %416  ;;  %v415_v62 = vpop.permute.xlu0 %414  ;;  %v816_v63 = vld [vmem:[#allocation2 + $0x4] ss:$12 sps:$4 sm:$0xff]   ;;  %v818_v0 = vld [vmem:[#allocation2] ss:$12 sps:$4 sm:$0xff]  }
  0xcb   : > { %395 = vst [vmem:[#allocation2 + $0x24] sm:$0x33] %v391_v60  ;;  %v419_v1 = vrot.slane %v417_v61, 4  ;;  %v418_v2 = vrot.slane %v415_v62, 4  ;;  %524 = vmatprep.subr.bf16.mxu0 %v816_v63 }
  0xcc   : > { %525 = vmatpush1.bf16.msra.mxu0 %v818_v0 }
  0xcd   : > { %v423_v3 = vsel %vm421_vm8, %v417_v61, %v419_v1  ;;  %v420_v4 = vsel %vm233_vm3, %v418_v2, %v419_v1 }
  0xce   : > { %427 = vst [vmem:[#allocation2 + $0x2c] sm:$0xc] %v423_v3  ;;  %v422_v5 = vsel %vm421_vm8, %v415_v62, %v420_v4  ;;  %v448_v6 = vpop.permute.xlu1 %447  ;;  %v446_v7 = vpop.permute.xlu0 %445 }
  0xcf   : > { %426 = vst [vmem:[#allocation2 + $0x24] sm:$0xcc] %v422_v5  ;;  %v450_v8 = vrot.slane %v448_v6, 4  ;;  %v449_v9 = vrot.slane %v446_v7, 4 }
  0xd1   : > { %v454_v10 = vsel %vm452_vm9, %v448_v6, %v450_v8  ;;  %v451_v11 = vsel %vm233_vm3, %v449_v9, %v450_v8 }
  0xd2   : > { %458 = vst [vmem:[#allocation2 + $0x38] sm:$0x3] %v454_v10  ;;  %v453_v12 = vsel %vm452_vm9, %v446_v7, %v451_v11 }
  0xd3   : > { %457 = vst [vmem:[#allocation2 + $0x30] sm:$0x33] %v453_v12 }
  0xd5   : > { %v819_v13 = vld [vmem:[#allocation2 + $0x20] ss:$12 sps:$4 sm:$0xff]  }
  0xd6   : > { %v820_v15 = vld [vmem:[#allocation2 + $0x1c] ss:$12 sps:$4 sm:$0xff]   ;;  %v822_v16 = vld [vmem:[#allocation2 + $0x18] ss:$12 sps:$4 sm:$0xff]   ;;  %741 = vmatpush3.bf16.msra.mxu1 %v819_v13 }
  0xd7   : > { %526 = vmatprep.subr.bf16.mxu0 %v820_v15  ;;  %742 = vmatprep.subr.bf16.mxu1 %v930_v14 }
  0xd8   : > { %527 = vmatpush1.bf16.msra.mxu0 %v822_v16 }
  0xd9   : > { %v824_v17 = vld [vmem:[#allocation2 + $0x38] ss:$0 sps:$4 sm:$0x33]  }
  0xda   : > { %v468_v18 = vld [vmem:[#allocation2 + $0x30] sm:$0x33]  ;;  %v522_v20 = vsel %vm514_vm10, %v824_v17, 0 }
  0xdb   : > { %v725_v19 = vcombine.high %v468_v18, %v468_v18  ;;  %v724_v21 = vcombine.low %v468_v18, %v468_v18  ;;  %743 = vmatpush3.bf16.msra.mxu1 %v522_v20 }
  0xdd   : > { %727 = vmatprep.subr.msk.bf16.mxu0 %vm514_vm10, %v725_v19  ;;  %v516_v23 = vsel %vm514_vm10, %v724_v21, 0 }
  0xde   : > { %529 = vmatpush1.bf16.msra.mxu0 %v516_v23  ;;  %745 = vmatmul.mubr.msk.bf16.vlgmr.msra.gmra.mrb[0].mxu1 %vm510_vm11, %v459_v22 }
  0xdf   : > { %v608_v14 = vpop.permute.xlu0 %607  ;;  %v615_v25 = vpop.permute.xlu1 %614 }
  0xe1   : > { %728 = vmatmul.mubr.msk.bf16.vlgmr.msra.gmra.mrb[0].mxu0 %vm510_vm11, %v459_v22 }
 0x1b1   : > { %v599_v24 = vpop.f32.mrb[0].mxu1 }
 0x1b2   : > { %v746_v26 = vpop.f32.mrb[1].mxu1  ;;  %v612_v27 = vmul.f32 %v608_v14, %v599_v24 }
 0x1b3   : > { %v602_v29 = vpop.f32.mrb[2].mxu1 }
 0x1b4   : > { %v558_v28 = vpop.f32.mrb[0].mxu0  ;;  %v747_v32 = vpop.f32.mrb[3].mxu1  ;;  %v619_v33 = vadd.f32 %v615_v25, %v612_v27 }
 0x1b5   : > { %v610_v30 = vmul.f32 %v608_v14, %v558_v28  ;;  %v560_v31 = vpop.f32.mrb[1].mxu0 }
 0x1b6   : > { %v611_v34 = vmul.f32 %v608_v14, %v560_v31  ;;  %v562_v35 = vpop.f32.mrb[2].mxu0  ;;  %622 = vst [vmem:[%s186_s30 + $0x10] sm:$0xff] %v619_v33 }
 0x1b7   : > { %v617_v36 = vadd.f32 %v615_v25, %v610_v30  ;;  %v563_v37 = vpop.f32.mrb[3].mxu0 }
 0x1b8   : > { %v618_v38 = vadd.f32 %v615_v25, %v611_v34 }
 0x1b9   : > { %620 = vst [vmem:[%s186_s30] sm:$0xff] %v617_v36 }
 0x1ba   : > { %621 = vst [vmem:[%s186_s30 + $0x8] sm:$0xff] %v618_v38 }
 0x1bb   : > { %869 = shalt.err (!%p866_p4)
}
 0x1bc   : > { %s870_s29 = scalar_lea.hbm %s1099_s6, 384  ;;  %s874_s19 = scalar_lea.hbm %s1146_s3, 768 }
 0x1bd   : > { %p871_p5 = scmp.ne.s32.totalorder %s1099_s6, %s870_s29  ;;  %p875_p0 = scmp.lt.u32.totalorder %s1099_s6, %s1146_s3 }
 0x1be   : > { %p876_p1 = scmp.lt.u32.totalorder %s874_s19, %s870_s29  ;;  %p878_p6 = scmp.lt.u32.totalorder %s870_s29, %s1099_s6 }
 0x1bf   : > { %p872_p8 = pnand %p871_p5, %p1155_p11 }
 0x1c0   : > { %p877_p3 = por %p876_p1, %p875_p0 }
 0x1c1   : > { %p873_p9 = pneg %p872_p8 }
 0x1c2   : > { %p879_p12 = por %p878_p6, %p877_p3 }
 0x1c4   : > { %p880_p13 = pnand %p879_p12, %p873_p9 }
 0x1c6   : > { %883 = shalt.err (!%p880_p13)
}
 0x1c7   : > { %752 = dma.vmem_to_hbm [thread:$0]  (%p1155_p11), %s1101_s5, 384, %s1099_s6, %s624_s16  }
 0x1c8 PF: > { %s650_s26 = sand.u32 1, %s910_s12   ;;  %p1156_p7 = scmp.ne.s32.totalorder %s1151_s25, 0 }
 0x1c9   : > { %p1157_p10 = scmp.ge.s32.totalorder %s922_s15, 2  ;;  %s651_s27 = scalar_lea.sflag [#allocation5], %s650_s26 }
 0x1cb   : > { %p759_p2 = pnand %p1157_p10, %p1156_p7 }
 0x1cd   : > { %905 = dma.done.wait (!%p759_p2), %s651_s27, 384  }
 0x1ce   : > { %907 = vsyncadd (!%p759_p2), %s651_s27, 4294966912  ;;  %p16_p4 = scmp.ge.s32.totalorder %s984_s18, 4   ;;  %s1158_s12 = smov %s914_s13 }
 0x1cf   : > { %s1159_s13 = smov %s918_s14  ;;  %s1160_s14 = smov %s996_s21 }
 0x1d0   : > { %s1161_s15 = smov %s984_s18  ;;  %18 = sbr.rel (!%p16_p4) target bundleno = 5 (0x5), region = 77 }
 0x1d7   :  { %656 = vsyncpa [#allocation4], 1 }
 0x1d8   :  { %658 = vsyncpa [#allocation4 + $0x1], 1 }
 0x1d9   :  { %659 = vsyncpa [#allocation5], 1 }
 0x1da   :  { %661 = vsyncpa [#allocation5 + $0x1], 1 }

</bundles_post_ra>
